<compile_context>
chip_gen: v6e
topology: v6e:2x2x1
jax: 0.10.0
libtpu: 0.0.40
codegen_flags: <defaults>
</compile_context>

<pallas_src>
import functools

import jax
import jax.numpy as jnp
from jax.experimental import pallas as pl
from jax.experimental.pallas import tpu as pltpu

_NEG_INF = -1e30  # fill value for padded class-logit lanes (finite -> no NaN risk)


def fc_kernel(x_ref, w1_ref, b1_ref, w2_ref, b2_ref, o_ref, *, bf16_epilogue):
    # x_ref:  (TB, Dp)  bf16      w1_ref: (Dp, H1p) bf16   b1_ref: (1, H1p) f32
    # w2_ref: (H1p, Cp) bf16      b2_ref: (1, Cp)   f32    o_ref:  (TB, Cp) f32
    # Linear 1 (bf16 MXU, f32 accumulate) + bias.
    h = jnp.dot(x_ref[...], w1_ref[...], preferred_element_type=jnp.float32)
    h = h + b1_ref[...]
    if bf16_epilogue:
        # v6e/v7x: bf16 EUP/VPU -> halve the tanh transcendental cost and the
        # result is already in the MXU input dtype for the second matmul.
        h = jnp.tanh(h.astype(jnp.bfloat16))
    else:
        # v5e: no bf16 VPU/EUP -> keep tanh in f32, cast only for the MXU.
        h = jnp.tanh(h).astype(jnp.bfloat16)

    # Linear 2 (bf16 MXU, f32 accumulate) + bias. Padded hidden lanes are
    # exact zeros; padded class lanes carry a -1e30 bias -> numerically inert.
    z = jnp.dot(h, w2_ref[...], preferred_element_type=jnp.float32) + b2_ref[...]

    # LogSoftmax over the class (lane) axis, numerically stable, in f32.
    m = jnp.max(z, axis=-1, keepdims=True)
    s = z - m
    lse = jnp.log(jnp.sum(jnp.exp(s), axis=-1, keepdims=True))
    o_ref[...] = (s - lse).astype(o_ref.dtype)


def _round_up(n, m):
    return ((n + m - 1) // m) * m


def _choose_tb(B):
    """Pick the batch tile so tiny batches stay tiny and large batches get
    big tiles + >=2 grid steps (v7x megacore)."""
    Bp16 = _round_up(max(B, 1), 16)  # bf16 sublane-packing multiple
    if Bp16 <= 128:
        return Bp16                  # single small tile, minimal padded rows
    for tb in (512, 256, 128):       # largest tile that still gives >=2 steps
        if Bp16 >= 2 * tb:
            return tb
    return 128


def _default_bf16_epilogue():
    """bf16 tanh epilogue on chips with bf16 VPU/EUP (v6e/v7x); f32 on v5e."""
    try:
        kind = jax.devices()[0].device_kind.lower()
    except Exception:
        return True
    return "v5" not in kind


def prepare_params(w1, b1, w2, b2, num_channels, hidden_dim):
    """Pad + cast weights/biases ONCE (call at init time, not per forward)."""
    D = num_channels * hidden_dim
    H1 = w1.shape[1]
    C = w2.shape[1]
    Dp = _round_up(D, 128)
    H1p = _round_up(H1, 128)   # 200 -> 256
    Cp = _round_up(C, 128)     # 10  -> 128 (lane-dense output store)

    w1_p = jnp.pad(w1, ((0, Dp - D), (0, H1p - H1))).astype(jnp.bfloat16)
    b1_p = jnp.pad(b1.reshape(1, H1), ((0, 0), (0, H1p - H1))).astype(jnp.float32)
    w2_p = jnp.pad(w2, ((0, H1p - H1), (0, Cp - C))).astype(jnp.bfloat16)
    b2_p = jnp.pad(b2.reshape(1, C).astype(jnp.float32),
                   ((0, 0), (0, Cp - C)), constant_values=_NEG_INF)
    return (w1_p, b1_p, w2_p, b2_p), (D, C)


def fc_forward(x, padded_params, D, C, *, bf16_epilogue=None):
    """x: (..., num_channels, hidden_dim). padded_params from prepare_params.
    Matches PyTorch: y = log_softmax(tanh(x.reshape(-1, D) @ W1 + b1) @ W2 + b2)."""
    if bf16_epilogue is None:
        bf16_epilogue = _default_bf16_epilogue()

    w1_p, b1_p, w2_p, b2_p = padded_params
    Dp, H1p = w1_p.shape
    Cp = w2_p.shape[1]

    x2d = x.reshape(-1, D).astype(jnp.float32)
    B = x2d.shape[0]

    tb = _choose_tb(B)
    Bp = _round_up(max(B, 1), tb)

    # Only the activations are padded/cast per call (unavoidable: x changes).
    x_p = jnp.pad(x2d, ((0, Bp - B), (0, Dp - D))).astype(jnp.bfloat16)

    grid = (Bp // tb,)
    kernel = functools.partial(fc_kernel, bf16_epilogue=bf16_epilogue)

    out_padded = pl.pallas_call(
        kernel,
        out_shape=jax.ShapeDtypeStruct((Bp, Cp), jnp.float32),
        grid=grid,
        in_specs=[
            # Activations: pipelined over the batch grid axis.
            pl.BlockSpec((tb, Dp), lambda i: (i, 0)),
            # Weights / biases: constant index_map -> DMA'd once, VMEM-resident.
            pl.BlockSpec((Dp, H1p), lambda i: (0, 0)),
            pl.BlockSpec((1, H1p), lambda i: (0, 0)),
            pl.BlockSpec((H1p, Cp), lambda i: (0, 0)),
            pl.BlockSpec((1, Cp), lambda i: (0, 0)),
        ],
        out_specs=pl.BlockSpec((tb, Cp), lambda i: (i, 0)),
        compiler_params=pltpu.CompilerParams(
            dimension_semantics=("parallel",)),
    )(x_p, w1_p, b1_p, w2_p, b2_p)

    # Strip batch + class padding.
    return out_padded[:B, :C]


def init_params(key, num_classes, num_channels, hidden_dim):
    # Deterministic init mimicking nn.Linear's uniform(-1/sqrt(fan_in), 1/sqrt(fan_in)).
    D = num_channels * hidden_dim
    H1 = 200
    k1, k2, k3, k4 = jax.random.split(key, 4)
    lim1 = 1.0 / jnp.sqrt(D)
    lim2 = 1.0 / jnp.sqrt(H1)
    w1 = jax.random.uniform(k1, (D, H1), jnp.float32, -lim1, lim1)   # (in, out) = W.T
    b1 = jax.random.uniform(k2, (1, H1), jnp.float32, -lim1, lim1)
    w2 = jax.random.uniform(k3, (H1, num_classes), jnp.float32, -lim2, lim2)
    b2 = jax.random.uniform(k4, (1, num_classes), jnp.float32, -lim2, lim2)
    return w1, b1, w2, b2


def fc_reference(x, w1, b1, w2, b2, num_channels, hidden_dim):
    # Pure-JAX f32 reference for correctness checking.
    x2d = x.reshape(-1, num_channels * hidden_dim)
    h = jnp.tanh(x2d @ w1 + b1)
    z = h @ w2 + b2
    return jax.nn.log_softmax(z, axis=1)


if __name__ == "__main__":
    num_classes = 10
    num_channels = 4
    hidden_dim = 32
    batch = 2

    key = jax.random.PRNGKey(0)
    kx, kp = jax.random.split(key)
    x = jax.random.normal(kx, (batch, num_channels, hidden_dim), jnp.float32)
    w1, b1, w2, b2 = init_params(kp, num_classes, num_channels, hidden_dim)

    # Pad + cast weights once (init time), reuse across forward calls.
    padded_params, (D, C) = prepare_params(w1, b1, w2, b2, num_channels, hidden_dim)

    out = fc_forward(x, padded_params, D, C)
    out = jax.block_until_ready(out)

    assert out.shape == (batch, num_classes)

    # Sanity 1: log-softmax rows should exponentiate-sum to ~1.
    row_sums = jnp.sum(jnp.exp(out), axis=1)
    assert bool(jnp.all(jnp.abs(row_sums - 1.0) < 1e-3))

    # Sanity 2: close to the f32 reference (loose tol for bf16 MXU inputs / tanh).
    ref = fc_reference(x, w1, b1, w2, b2, num_channels, hidden_dim)
    assert bool(jnp.max(jnp.abs(out - ref)) < 5e-2)

    print("KERNEL_OK")
</pallas_src>

<mosaic_0001>
module attributes {stable_mosaic.version = 11 : i64} {
  func.func @fc_kernel(%arg0: i32, %arg1: memref<16x128xbf16, #tpu.memory_space<vmem>>, %arg2: memref<128x256xbf16, #tpu.memory_space<vmem>>, %arg3: memref<1x256xf32, #tpu.memory_space<vmem>>, %arg4: memref<256x128xbf16, #tpu.memory_space<vmem>>, %arg5: memref<1x128xf32, #tpu.memory_space<vmem>>, %arg6: memref<16x128xf32, #tpu.memory_space<vmem>>) attributes {dimension_semantics = [#tpu.dimension_semantics<parallel>], iteration_bounds = array<i64: 1>, scalar_prefetch = 0 : i64, scratch_operands = 0 : i64, tpu.core_type = #tpu.core_type<tc>, window_params = [{transform_indices = @transform_0, window_bounds = array<i64: 16, 128>}, {pipeline_mode = #tpu.pipeline_mode<synchronous>, transform_indices = @transform_1, window_bounds = array<i64: 128, 256>}, {pipeline_mode = #tpu.pipeline_mode<synchronous>, transform_indices = @transform_2, window_bounds = array<i64: 1, 256>}, {pipeline_mode = #tpu.pipeline_mode<synchronous>, transform_indices = @transform_3, window_bounds = array<i64: 256, 128>}, {pipeline_mode = #tpu.pipeline_mode<synchronous>, transform_indices = @transform_4, window_bounds = array<i64: 1, 128>}, {transform_indices = @transform_5, window_bounds = array<i64: 16, 128>}]} {
    %c0 = arith.constant 0 : index
    %c0_0 = arith.constant 0 : index
    %0 = vector.load %arg1[%c0, %c0_0] : memref<16x128xbf16, #tpu.memory_space<vmem>>, vector<16x128xbf16>
    %c0_1 = arith.constant 0 : index
    %c0_2 = arith.constant 0 : index
    %1 = vector.load %arg2[%c0_1, %c0_2] : memref<128x256xbf16, #tpu.memory_space<vmem>>, vector<128x256xbf16>
    %cst = arith.constant dense<0.000000e+00> : vector<16x256xf32>
    %2 = tpu.matmul %0, %1, %cst {dimension_numbers = #tpu.dot_dimension_numbers<[1], [0], [0], [1], [0, 0, 1, 1], [], []>} : vector<16x128xbf16>, vector<128x256xbf16>, vector<16x256xf32> -> vector<16x256xf32>
    %c0_3 = arith.constant 0 : index
    %c0_4 = arith.constant 0 : index
    %3 = vector.load %arg3[%c0_3, %c0_4] : memref<1x256xf32, #tpu.memory_space<vmem>>, vector<1x256xf32>
    %4 = vector.broadcast %3 : vector<1x256xf32> to vector<16x256xf32>
    %5 = arith.addf %2, %4 : vector<16x256xf32>
    %6 = arith.truncf %5 : vector<16x256xf32> to vector<16x256xbf16>
    %7 = math.tanh %6 : vector<16x256xbf16>
    %c0_5 = arith.constant 0 : index
    %c0_6 = arith.constant 0 : index
    %8 = vector.load %arg4[%c0_5, %c0_6] : memref<256x128xbf16, #tpu.memory_space<vmem>>, vector<256x128xbf16>
    %cst_7 = arith.constant dense<0.000000e+00> : vector<16x128xf32>
    %9 = tpu.matmul %7, %8, %cst_7 {dimension_numbers = #tpu.dot_dimension_numbers<[1], [0], [0], [1], [0, 0, 1, 1], [], []>} : vector<16x256xbf16>, vector<256x128xbf16>, vector<16x128xf32> -> vector<16x128xf32>
    %c0_8 = arith.constant 0 : index
    %c0_9 = arith.constant 0 : index
    %10 = vector.load %arg5[%c0_8, %c0_9] : memref<1x128xf32, #tpu.memory_space<vmem>>, vector<1x128xf32>
    %11 = vector.broadcast %10 : vector<1x128xf32> to vector<16x128xf32>
    %12 = arith.addf %9, %11 : vector<16x128xf32>
    %cst_10 = arith.constant dense<0xFF800000> : vector<16xf32>
    %13 = vector.multi_reduction <maximumf>, %12, %cst_10 [1] : vector<16x128xf32> to vector<16xf32>
    %14 = vector.shape_cast %13 : vector<16xf32> to vector<16x1xf32>
    %15 = vector.broadcast %14 : vector<16x1xf32> to vector<16x128xf32>
    %16 = arith.subf %12, %15 : vector<16x128xf32>
    %17 = math.exp %16 : vector<16x128xf32>
    %cst_11 = arith.constant dense<0.000000e+00> : vector<16xf32>
    %18 = vector.multi_reduction <add>, %17, %cst_11 [1] : vector<16x128xf32> to vector<16xf32>
    %19 = vector.shape_cast %18 : vector<16xf32> to vector<16x1xf32>
    %20 = math.log %19 : vector<16x1xf32>
    %21 = vector.broadcast %20 : vector<16x1xf32> to vector<16x128xf32>
    %22 = arith.subf %16, %21 : vector<16x128xf32>
    %c0_12 = arith.constant 0 : index
    %c0_13 = arith.constant 0 : index
    %23 = vector.load %arg6[%c0_12, %c0_13] : memref<16x128xf32, #tpu.memory_space<vmem>>, vector<16x128xf32>
    tpu.vector_store %arg6[%c0_12, %c0_13], %22 {strides = array<i32>} : memref<16x128xf32, #tpu.memory_space<vmem>>, vector<16x128xf32>,
    return
  }
  func.func @transform_0(%arg0: i32) -> (i32, i32) {
    %c0_i32 = arith.constant 0 : i32
    %c0_i32_0 = arith.constant 0 : i32
    return %arg0, %c0_i32 : i32, i32
  }
  func.func @transform_1(%arg0: i32) -> (i32, i32) {
    %c0_i32 = arith.constant 0 : i32
    %c0_i32_0 = arith.constant 0 : i32
    %c0_i32_1 = arith.constant 0 : i32
    return %c0_i32, %c0_i32_0 : i32, i32
  }
  func.func @transform_2(%arg0: i32) -> (i32, i32) {
    %c0_i32 = arith.constant 0 : i32
    %c0_i32_0 = arith.constant 0 : i32
    %c0_i32_1 = arith.constant 0 : i32
    return %c0_i32, %c0_i32_0 : i32, i32
  }
  func.func @transform_3(%arg0: i32) -> (i32, i32) {
    %c0_i32 = arith.constant 0 : i32
    %c0_i32_0 = arith.constant 0 : i32
    %c0_i32_1 = arith.constant 0 : i32
    return %c0_i32, %c0_i32_0 : i32, i32
  }
  func.func @transform_4(%arg0: i32) -> (i32, i32) {
    %c0_i32 = arith.constant 0 : i32
    %c0_i32_0 = arith.constant 0 : i32
    %c0_i32_1 = arith.constant 0 : i32
    return %c0_i32, %c0_i32_0 : i32, i32
  }
  func.func @transform_5(%arg0: i32) -> (i32, i32) {
    %c0_i32 = arith.constant 0 : i32
    %c0_i32_0 = arith.constant 0 : i32
    return %arg0, %c0_i32 : i32, i32
  }
}

</mosaic_0001>

<bundles_post_ra>
// kernel: tpu_custom_call.1
= control target key start
LH: loop header
LB: loop body
LE: loop exit
PB: predicated region body
PF: predicated region fallthrough
CT: control target
= control target key end

     0   :  { %10 = vsyncpa [#allocation3], 0  ;;  %s709_s0 = inlined_call_operand.hbm [shape: bf16[16,128], index: 0, kind: input, shape index: {}]   ;;  %s710_s1 = inlined_call_operand.hbm [shape: bf16[128,256], index: 1, kind: input, shape index: {}]   ;;  %s711_s2 = inlined_call_operand.vmem [shape: f32[1,256], index: 2, kind: input, shape index: {}]   ;;  %s712_s3 = inlined_call_operand.hbm [shape: bf16[256,128], index: 3, kind: input, shape index: {}]   ;;  %s713_s4 = inlined_call_operand.vmem [shape: f32[1,128], index: 4, kind: input, shape index: {}]   ;;  %s714_s5 = inlined_call_operand.hbm [shape: f32[16,128], index: 5, kind: output, shape index: {}]  }
   0x1   :  { %11 = vsyncpa [#allocation6], 0 }
   0x2   :  { %12 = vsyncpa [#allocation4], 0  ;;  %s646_s18 = smov [#allocation5]  }
   0x3   :  { %s30_s19 = sshll.u32 %s646_s18, 4  ;;  %s31_s19 = int_to_ptr.vmem [resolvable:$true] %s30_s19 }
   0x4   :  { %s568_s20 = scalar_lea.vmem %s31_s19, 2048  ;;  %p573_p1 = scmp.lt.s32.totalorder %s31_s19, %s31_s19 }
   0x5   :  { %p569_p0 = scmp.ne.s32.totalorder %s31_s19, %s568_s20  ;;  %p574_p2 = scmp.lt.s32.totalorder %s568_s20, %s568_s20 }
   0x7   :  { %p575_p3 = por %p574_p2, %p573_p1 }
   0x9   :  { %p576_p4 = pnand %p575_p3, %p569_p0 }
   0xb   :  { %579 = shalt.err (!%p576_p4)
}
   0xc   :  { %s647_s21 = smov 128   ;;  %s648_s22 = smov 8  }
   0xd   :  { %36 = dma.hbm_to_vmem [thread:$0]  %s710_s1, 2048, %s31_s19, [#allocation6], %s647_s21, %s647_s21, %s648_s22  }
   0xe   :  { %s649_s25 = smov [#allocation2]  }
   0xf   :  { %s18_s26 = sshll.u32 %s649_s25, 4  ;;  %s19_s26 = int_to_ptr.vmem [resolvable:$true] %s18_s26 }
  0x10   :  { %s588_s27 = scalar_lea.vmem %s19_s26, 128  ;;  %p593_p6 = scmp.lt.s32.totalorder %s19_s26, %s19_s26 }
  0x11   :  { %p589_p5 = scmp.ne.s32.totalorder %s19_s26, %s588_s27  ;;  %p594_p7 = scmp.lt.s32.totalorder %s588_s27, %s588_s27 }
  0x13   :  { %p595_p8 = por %p594_p7, %p593_p6 }
  0x15   :  { %p596_p9 = pnand %p595_p8, %p589_p5 }
  0x17   :  { %599 = shalt.err (!%p596_p9)
}
  0x18   :  { %s650_s28 = smov 64   ;;  %s651_s29 = smov 4  }
  0x19   :  { %24 = dma.hbm_to_vmem [thread:$0]  %s709_s0, 128, %s19_s26, [#allocation3], %s650_s28, %s650_s28, %s651_s29  }
  0x1a   :  { %s652_s7 = smov [#allocation7]  }
  0x1b   :  { %s44_s8 = sshll.u32 %s652_s7, 4  ;;  %s45_s8 = int_to_ptr.vmem [resolvable:$true] %s44_s8 }
  0x1c   :  { %s608_s1 = scalar_lea.vmem %s45_s8, 2048  ;;  %p613_p11 = scmp.lt.s32.totalorder %s45_s8, %s45_s8 }
  0x1d   :  { %p609_p10 = scmp.ne.s32.totalorder %s45_s8, %s608_s1  ;;  %p614_p12 = scmp.lt.s32.totalorder %s608_s1, %s608_s1 }
  0x1f   :  { %p615_p13 = por %p614_p12, %p613_p11 }
  0x21   :  { %p616_p0 = pnand %p615_p13, %p609_p10 }
  0x23   :  { %619 = shalt.err (!%p616_p0)
}
  0x24   :  { %50 = dma.hbm_to_vmem [thread:$0]  %s712_s3, 2048, %s45_s8, [#allocation6], %s650_s28, %s650_s28, %s651_s29  }
  0x25   :  { %640 = dma.done.wait [#allocation3], 128  }
  0x26   :  { %641 = vsyncadd [#allocation3], 4294967168 }
  0x27   :  { %642 = dma.done.wait [#allocation6], 4096  }
  0x28   :  { %643 = vsyncadd [#allocation6], 4294963200  ;;  %v653_v0 = vmov 0   ;;  %v507_v1 = vld [vmem:[#allocation5 + $0x74] ss:$8 sps:$4 sm:$0xff]   ;;  %v536_v22 = vld [vmem:[#allocation7 + $0x68] sm:$0xff]   ;;  %v83_v34 = vlaneseq }
  0x29   :  { %211 = vmatprep.mubr.bf16.mxu0 %v653_v0  ;;  %v509_v2 = vld [vmem:[#allocation5 + $0x70] ss:$8 sps:$4 sm:$0xff]   ;;  %179 = vmatprep.subr.bf16.mxu0 %v507_v1  ;;  %v510_v3 = vld [vmem:[#allocation5 + $0x64] ss:$8 sps:$4 sm:$0xff]   ;;  %v512_v4 = vld [vmem:[#allocation5 + $0x60] ss:$8 sps:$4 sm:$0xff]  }
  0x2a   :  { %180 = vmatpush1.bf16.msra.mxu0 %v509_v2  ;;  %v513_v5 = vld [vmem:[#allocation5 + $0x54] ss:$8 sps:$4 sm:$0xff]   ;;  %v515_v6 = vld [vmem:[#allocation5 + $0x50] ss:$8 sps:$4 sm:$0xff]   ;;  %v516_v7 = vld [vmem:[#allocation5 + $0x44] ss:$8 sps:$4 sm:$0xff]  }
  0x2b   :  { %181 = vmatprep.subr.bf16.mxu0 %v510_v3  ;;  %v518_v8 = vld [vmem:[#allocation5 + $0x40] ss:$8 sps:$4 sm:$0xff]   ;;  %v519_v9 = vld [vmem:[#allocation5 + $0x34] ss:$8 sps:$4 sm:$0xff]   ;;  %v521_v11 = vld [vmem:[#allocation5 + $0x30] ss:$8 sps:$4 sm:$0xff]  }
  0x2c   :  { %v532_v10 = vld [vmem:[#allocation7 + $0x78] sm:$0xff]   ;;  %v522_v13 = vld [vmem:[#allocation5 + $0x24] ss:$8 sps:$4 sm:$0xff]   ;;  %v534_v14 = vld [vmem:[#allocation7 + $0x70] sm:$0xff]   ;;  %v84_v35 = vshrl.u32 %v83_v34, 7 }
  0x2d   :  { %v533_v12 = vld [vmem:[#allocation7 + $0x38] sm:$0xff]   ;;  %476 = vmatprep.subr.bf16.mxu1 %v532_v10  ;;  %v524_v15 = vld [vmem:[#allocation5 + $0x20] ss:$8 sps:$4 sm:$0xff]   ;;  %v528_v18 = vld [vmem:[#allocation5 + $0x4] ss:$8 sps:$4 sm:$0xff]  }
  0x2e   :  { %182 = vmatpush1.bf16.msra.mxu0 %v512_v4  ;;  %477 = vmatpush3.bf16.msra.mxu1 %v533_v12  ;;  %v525_v16 = vld [vmem:[#allocation5 + $0x14] ss:$8 sps:$4 sm:$0xff]   ;;  %v527_v17 = vld [vmem:[#allocation5 + $0x10] ss:$8 sps:$4 sm:$0xff]   ;;  %v530_v19 = vld [vmem:[#allocation5] ss:$8 sps:$4 sm:$0xff]  }
  0x2f   :  { %183 = vmatprep.subr.bf16.mxu0 %v513_v5  ;;  %478 = vmatprep.subr.bf16.mxu1 %v534_v14  ;;  %v531_v20 = vld [vmem:[#allocation2] sm:$0xff]   ;;  %v535_v21 = vld [vmem:[#allocation7 + $0x30] sm:$0xff]   ;;  %v537_v23 = vld [vmem:[#allocation7 + $0x28] sm:$0xff]   ;;  %v85_v36 = vsub.s32 0, %v84_v35  ;;  %v89_v38 = vsub.s32 1, %v84_v35 }
  0x30   :  { %v538_v24 = vld [vmem:[#allocation7 + $0x60] sm:$0xff]   ;;  %v540_v26 = vld [vmem:[#allocation7 + $0x58] sm:$0xff]   ;;  %v542_v28 = vld [vmem:[#allocation7 + $0x50] sm:$0xff]  }
  0x31   :  { %v539_v25 = vld [vmem:[#allocation7 + $0x20] sm:$0xff]   ;;  %v541_v27 = vld [vmem:[#allocation7 + $0x18] sm:$0xff]   ;;  %v543_v29 = vld [vmem:[#allocation7 + $0x10] sm:$0xff]  }
  0x32   :  { %184 = vmatpush1.bf16.msra.mxu0 %v515_v6  ;;  %479 = vmatpush3.bf16.msra.mxu1 %v535_v21  ;;  %v544_v30 = vld [vmem:[#allocation7 + $0x48] sm:$0xff]   ;;  %v546_v32 = vld [vmem:[#allocation7 + $0x40] sm:$0xff]   ;;  %v81_v37 = vld [vmem:[%s711_s2] sm:$0x3] }
  0x33   :  { %185 = vmatprep.subr.bf16.mxu0 %v516_v7  ;;  %480 = vmatprep.subr.bf16.mxu1 %v536_v22  ;;  %v545_v31 = vld [vmem:[#allocation7 + $0x8] sm:$0xff]   ;;  %v547_v33 = vld [vmem:[#allocation7] sm:$0xff]   ;;  %v86_v40 = vrot.slane %v81_v37, %v85_v36  ;;  %v90_v42 = vrot.slane %v81_v37, %v89_v38  ;;  %v459_v55 = vld [vmem:[%s713_s4] ss:$0 sm:$0xff]  ;;  %s654_s4 = smov [#allocation8]  }
  0x34   :  { %s429_s12 = sshll.u32 %s654_s4, 4  ;;  %s430_s12 = int_to_ptr.vmem [resolvable:$true] %s429_s12 }
  0x35   :  { %s620_s13 = scalar_lea.vmem %s430_s12, 256  ;;  %p625_p2 = scmp.lt.s32.totalorder %s430_s12, %s430_s12 }
  0x36   :  { %186 = vmatpush1.bf16.msra.mxu0 %v518_v8  ;;  %481 = vmatpush3.bf16.msra.mxu1 %v537_v23  ;;  %p621_p1 = scmp.ne.s32.totalorder %s430_s12, %s620_s13  ;;  %p626_p3 = scmp.lt.s32.totalorder %s620_s13, %s620_s13 }
  0x37   :  { %187 = vmatprep.subr.bf16.mxu0 %v519_v9  ;;  %482 = vmatprep.subr.bf16.mxu1 %v538_v24 }
  0x38   :  { %p627_p4 = por %p626_p3, %p625_p2 }
  0x3a   :  { %188 = vmatpush1.bf16.msra.mxu0 %v521_v11  ;;  %483 = vmatpush3.bf16.msra.mxu1 %v539_v25  ;;  %p628_p5 = pnand %p627_p4, %p621_p1 }
  0x3b   :  { %189 = vmatprep.subr.bf16.mxu0 %v522_v13  ;;  %484 = vmatprep.subr.bf16.mxu1 %v540_v26 }
  0x3e   :  { %190 = vmatpush1.bf16.msra.mxu0 %v524_v15  ;;  %485 = vmatpush3.bf16.msra.mxu1 %v541_v27 }
  0x3f   :  { %191 = vmatprep.subr.bf16.mxu0 %v525_v16  ;;  %486 = vmatprep.subr.bf16.mxu1 %v542_v28 }
  0x42   :  { %192 = vmatpush1.bf16.msra.mxu0 %v527_v17  ;;  %487 = vmatpush3.bf16.msra.mxu1 %v543_v29 }
  0x43   :  { %193 = vmatprep.subr.bf16.mxu0 %v528_v18  ;;  %488 = vmatprep.subr.bf16.mxu1 %v544_v30 }
  0x46   :  { %194 = vmatpush1.bf16.msra.mxu0 %v530_v19  ;;  %489 = vmatpush3.bf16.msra.mxu1 %v545_v31 }
  0x47   :  { %490 = vmatprep.subr.bf16.mxu1 %v546_v32 }
  0x49   :  { %212 = vmatmul.mubr.bf16.vlgmr.msra.gmra.mxu0 %v531_v20 }
  0x4a   :  { %491 = vmatpush3.bf16.msra.mxu1 %v547_v33 }
 0x109   :  { %v213_v39 = vpop.f32.mrf.mxu0 }
 0x10a   :  { %v214_v45 = vadd.f32 %v213_v39, %v86_v40 }
 0x10b   :  { %v215_v41 = vpop.f32.mrf.mxu0 }
 0x10c   :  { %v216_v47 = vadd.f32 %v215_v41, %v90_v42 }
 0x10d   :  { %v217_v43 = vpop.f32.mrf.mxu0 }
 0x10e   :  { %v218_v44 = vadd.f32 %v217_v43, %v86_v40 }
 0x10f   :  { %v219_v46 = vpop.f32.mrf.mxu0 }
 0x110   :  { %v220_v48 = vadd.f32 %v219_v46, %v90_v42  ;;  %v222_v49 = vpack.c.bf16 %v218_v44, %v214_v45 }
 0x112   :  { %v223_v50 = vpack.c.bf16 %v220_v48, %v216_v47 }
 0x114   :  { %548 = vtanh.bf16 %v223_v50 }
 0x115   :  { %550 = vtanh.bf16 %v222_v49 }
 0x122   :  { %v549_v51 = vpop.eup %548 }
 0x123   :  { %v551_v52 = vpop.eup %550  ;;  %393 = vmatprep.mubr.bf16.mxu1 %v549_v51 }
 0x124   :  { %394 = vmatmul.mubr.bf16.vlgmr.msra.gmra.mxu1 %v551_v52 }
 0x1e4   :  { %v492_v53 = vpop.f32.mrf.mxu1 }
 0x1e6   :  { %v493_v54 = vpop.f32.mrf.mxu1 }
 0x1e7   :  { %v494_v56 = vadd.f32 %v493_v54, %v492_v53 }
 0x1e8   :  { %v495_v57 = vpop.f32.mrf.mxu1 }
 0x1e9   :  { %v396_v58 = vadd.f32 %v494_v56, %v459_v55 }
 0x1ea   :  { %v496_v59 = vpop.f32.mrf.mxu1 }
 0x1eb   :  { %v497_v60 = vadd.f32 %v496_v59, %v495_v57  ;;  %402 = vmax.xlane.f32.xlu0 %v396_v58 }
 0x1ed   :  { %v399_v61 = vadd.f32 %v497_v60, %v459_v55 }
 0x1ef   :  { %404 = vmax.xlane.f32.xlu0 %v399_v61 }
 0x274   :  { %v403_v62 = vpop.xlane.xlu0 %402 }
 0x275   :  { %v406_v63 = vsub.f32 %v396_v58, %v403_v62 }
 0x277   :  { %v408_v0 = vmul.f32 1.442695, %v406_v63 }
 0x278   :  { %v405_v1 = vpop.xlane.xlu0 %404 }
 0x279   :  { %v407_v2 = vsub.f32 %v399_v61, %v405_v1  ;;  %552 = vpow2.f32 %v408_v0 }
 0x27b   :  { %v410_v3 = vmul.f32 1.442695, %v407_v2 }
 0x27d   :  { %554 = vpow2.f32 %v410_v3 }
 0x286   :  { %v553_v4 = vpop.eup %552 }
 0x287   :  { %412 = vadd.xlane.f32.xlu1 %v553_v4 }
 0x28a   :  { %v555_v5 = vpop.eup %554 }
 0x28b   :  { %414 = vadd.xlane.f32.xlu1 %v555_v5 }
 0x310   :  { %v413_v6 = vpop.xlane.xlu1 %412 }
 0x311   :  { %556 = vlog2.f32 %v413_v6 }
 0x314   :  { %v415_v7 = vpop.xlane.xlu1 %414 }
 0x315   :  { %558 = vlog2.f32 %v415_v7 }
 0x31e   :  { %v557_v8 = vpop.eup %556 }
 0x31f   :  { %v417_v9 = vmul.f32 0.6931472, %v557_v8 }
 0x321   :  { %v420_v10 = vsub.f32 %v406_v63, %v417_v9 }
 0x322   :  { %v559_v11 = vpop.eup %558 }
 0x323   :  { %v419_v12 = vmul.f32 0.6931472, %v559_v11  ;;  %422 = vst [vmem:[#allocation8] sm:$0xff] %v420_v10 }
 0x325   :  { %v421_v13 = vsub.f32 %v407_v2, %v419_v12 }
 0x327   :  { %423 = vst [vmem:[#allocation8 + $0x8] sm:$0xff] %v421_v13 }
 0x328   :  { %631 = shalt.err (!%p628_p5)
}
 0x329   :  { %435 = dma.vmem_to_hbm [thread:$0]  %s430_s12, 256, %s714_s5, [#allocation4], %s647_s21, %s647_s21, %s648_s22  }
 0x32a   :  { %644 = dma.done.wait [#allocation4], 256  }
 0x32b   :  { %645 = vsyncadd [#allocation4], 4294967040 }
 0x32c   :  { %439 = vsyncpa [#allocation3], 1 }
 0x32d   :  { %440 = vsyncpa [#allocation6], 1 }
 0x32e   :  { %441 = vsyncpa [#allocation4], 1 }

</bundles_post_ra>
